<compile_context>
chip_gen: v7x
topology: tpu7x:2x2x1
jax: 0.10.0
libtpu: 0.0.40
codegen_flags: <defaults>
</compile_context>

<pallas_src>
import math
import functools

import jax
import jax.numpy as jnp
from jax import lax
from jax.experimental import pallas as pl
from jax.experimental.pallas import tpu as pltpu

_LN_EPS = 1e-5
_INV_SQRT2 = 1.0 / math.sqrt(2.0)
_VMEM_LIMIT = 64 * 1024 * 1024      # fits v7x (64 MiB) as well as v5e/v6e


def _cparams(dims):
    return pltpu.CompilerParams(dimension_semantics=dims,
                                vmem_limit_bytes=_VMEM_LIMIT)


def _layernorm_f32(x, g, b):
    """x: (R, C) f32; g, b: (1, C) f32."""
    mu = jnp.mean(x, axis=-1, keepdims=True)
    var = jnp.mean(jnp.square(x - mu), axis=-1, keepdims=True)
    return (x - mu) * lax.rsqrt(var + jnp.float32(_LN_EPS)) * g + b


# ----------------------------------------------------------------------------
# Kernels
# ----------------------------------------------------------------------------
def _block_attn_kernel(x_ref, g1_ref, b1_ref, wqkvt_ref, bqkv_ref, wp_ref,
                       bp_ref, o_ref, qkv_sc, y_sc, *, n_head, head_dim, scale):
    """Fused: LN1 + QKV proj + causal MHA + output proj + residual add.

    One grid program per batch element.  qkv is kept transposed (3C, T) in
    VMEM so per-head slices are sublane-aligned; concat(heads) lives in a
    (C, T) scratch; the output projection is a single (T,C)@(C,C) matmul.
    """
    T, C = x_ref.shape
    x = x_ref[...].astype(jnp.float32)                       # residual base
    h = _layernorm_f32(x, g1_ref[...], b1_ref[...])
    # qkv^T (3C, T) = Wqkv_t (3C, C) contracted with h (T, C) over C.
    qkv_t = lax.dot_general(wqkvt_ref[...], h.astype(jnp.bfloat16),
                            (((1,), (1,)), ((), ())),
                            preferred_element_type=jnp.float32) + bqkv_ref[...]
    qkv_sc[...] = qkv_t

    row = lax.broadcasted_iota(jnp.int32, (T, T), 0)
    col = lax.broadcasted_iota(jnp.int32, (T, T), 1)
    causal = col <= row

    @pl.loop(0, n_head)
    def _(hh):
        off = hh * head_dim
        off_q = pl.multiple_of(off, head_dim)
        off_k = pl.multiple_of(C + off, head_dim)
        off_v = pl.multiple_of(2 * C + off, head_dim)
        qh = jnp.transpose(qkv_sc[pl.ds(off_q, head_dim), :]).astype(jnp.bfloat16)
        kh_t = qkv_sc[pl.ds(off_k, head_dim), :].astype(jnp.bfloat16)   # (hd, T)
        vh_t = qkv_sc[pl.ds(off_v, head_dim), :].astype(jnp.bfloat16)   # (hd, T)
        att = jnp.dot(qh, kh_t, preferred_element_type=jnp.float32) * scale
        att = jnp.where(causal, att, jnp.float32(-1e30))
        m = jnp.max(att, axis=-1, keepdims=True)
        e = jnp.exp(att - m)
        p = e * pl.reciprocal(jnp.sum(e, axis=-1, keepdims=True), approx=True)
        # y_h^T (hd, T) = V^T @ P^T  (A.B^T contraction)
        yh_t = lax.dot_general(vh_t, p.astype(jnp.bfloat16),
                               (((1,), (1,)), ((), ())),
                               preferred_element_type=jnp.float32)
        y_sc[pl.ds(off_q, head_dim), :] = yh_t

    y = jnp.transpose(y_sc[...]).astype(jnp.bfloat16)        # (T, C) concat-heads
    branch = jnp.dot(y, wp_ref[...], preferred_element_type=jnp.float32)
    o_ref[...] = (x + branch + bp_ref[...]).astype(o_ref.dtype)


def _basic_attn_kernel(x_ref, zkt_ref, gf_ref, bf_ref, g1_ref, b1_ref,
                       wqt_ref, bq_ref, wp_ref, bp_ref, o_ref, q_sc, y_sc,
                       *, n_head, head_dim, scale):
    """Fused: ln_f + BasicAttention branch + residual (per batch element).

       xf  = LN_f(x)
       out = xf + Proj(softmax(Q(LN1(xf)) @ z_k^T / sqrt(hd)) @ z_k)
    (reference quirk: both k AND v come from z_k, unprojected)."""
    T, C = x_ref.shape
    xp = x_ref[...].astype(jnp.float32)
    xf = _layernorm_f32(xp, gf_ref[...], bf_ref[...])        # ln_f fused here
    h = _layernorm_f32(xf, g1_ref[...], b1_ref[...])
    q_t = lax.dot_general(wqt_ref[...], h.astype(jnp.bfloat16),
                          (((1,), (1,)), ((), ())),
                          preferred_element_type=jnp.float32) + bq_ref[...]
    q_sc[...] = q_t                                          # (C, T)

    @pl.loop(0, n_head)
    def _(hh):
        off = pl.multiple_of(hh * head_dim, head_dim)
        qh = jnp.transpose(q_sc[pl.ds(off, head_dim), :]).astype(jnp.bfloat16)
        kh_t = zkt_ref[pl.ds(off, head_dim), :]              # (hd, T) bf16; also v
        att = jnp.dot(qh, kh_t, preferred_element_type=jnp.float32) * scale
        m = jnp.max(att, axis=-1, keepdims=True)
        e = jnp.exp(att - m)
        p = e * pl.reciprocal(jnp.sum(e, axis=-1, keepdims=True), approx=True)
        yh_t = lax.dot_general(kh_t, p.astype(jnp.bfloat16),
                               (((1,), (1,)), ((), ())),
                               preferred_element_type=jnp.float32)
        y_sc[pl.ds(off, head_dim), :] = yh_t

    y = jnp.transpose(y_sc[...]).astype(jnp.bfloat16)
    branch = jnp.dot(y, wp_ref[...], preferred_element_type=jnp.float32)
    o_ref[...] = (xf + branch + bp_ref[...]).astype(o_ref.dtype)


def _ln_mlp_res_kernel(x_ref, g_ref, b_ref, w1_ref, b1_ref, w2_ref, b2_ref, o_ref):
    """o = x + Linear2(GELU(Linear1(LayerNorm(x))))  — whole MLP branch fused."""
    x = x_ref[...].astype(jnp.float32)
    h = _layernorm_f32(x, g_ref[...], b_ref[...])
    a = jnp.dot(h.astype(w1_ref.dtype), w1_ref[...],
                preferred_element_type=jnp.float32) + b1_ref[...]
    a = 0.5 * a * (1.0 + lax.erf(a * jnp.float32(_INV_SQRT2)))   # exact GELU
    y = jnp.dot(a.astype(w2_ref.dtype), w2_ref[...],
                preferred_element_type=jnp.float32) + b2_ref[...]
    o_ref[...] = (x + y).astype(o_ref.dtype)


def _ln_head_kernel(x_ref, g_ref, b_ref, w_ref, o_ref):
    """o = LayerNorm(x) @ head_w  (no bias); tiled over rows and vocab."""
    x = x_ref[...].astype(jnp.float32)
    h = _layernorm_f32(x, g_ref[...], b_ref[...])
    o_ref[...] = jnp.dot(h.astype(w_ref.dtype), w_ref[...],
                         preferred_element_type=jnp.float32).astype(o_ref.dtype)


def _ln_head_loss_kernel(x_ref, g_ref, b_ref, w_ref, t_ref,
                         logits_ref, loss_ref, m_sc, l_sc, tgt_sc):
    """Head projection + fused cross-entropy (online logsumexp over vocab tiles)."""
    j = pl.program_id(1)
    nj = pl.num_programs(1)
    tn = logits_ref.shape[1]

    x = x_ref[...].astype(jnp.float32)
    h = _layernorm_f32(x, g_ref[...], b_ref[...])
    z = jnp.dot(h.astype(w_ref.dtype), w_ref[...],
                preferred_element_type=jnp.float32)
    logits_ref[...] = z.astype(logits_ref.dtype)

    @pl.when(j == 0)
    def _():
        m_sc[...] = jnp.full_like(m_sc, -jnp.inf)
        l_sc[...] = jnp.zeros_like(l_sc)
        tgt_sc[...] = jnp.zeros_like(tgt_sc)

    m_prev = m_sc[...]
    m_new = jnp.maximum(m_prev, jnp.max(z, axis=-1, keepdims=True))
    l_sc[...] = (l_sc[...] * jnp.exp(m_prev - m_new)
                 + jnp.sum(jnp.exp(z - m_new), axis=-1, keepdims=True))
    m_sc[...] = m_new

    col = lax.broadcasted_iota(jnp.int32, z.shape, 1) + j * tn
    hit = col == t_ref[...]                              # (tm, tn) vs (tm, 1)
    tgt_sc[...] += jnp.sum(jnp.where(hit, z, 0.0), axis=-1, keepdims=True)

    @pl.when(j == nj - 1)
    def _():
        loss_ref[...] = m_sc[...] + jnp.log(l_sc[...]) - tgt_sc[...]


# ----------------------------------------------------------------------------
# pallas_call wrappers
# ----------------------------------------------------------------------------
def fused_block_attn(x_flat, blk, B, T, C, n_head):
    hd = C // n_head
    assert C % n_head == 0 and hd % 8 == 0, "head_dim must be a multiple of 8"
    a = blk["attn"]
    x3 = x_flat.reshape(B, T, C)
    kernel = functools.partial(_block_attn_kernel, n_head=n_head, head_dim=hd,
                               scale=1.0 / math.sqrt(hd))
    out = pl.pallas_call(
        kernel,
        out_shape=jax.ShapeDtypeStruct((B, T, C), jnp.bfloat16),
        grid=(B,),
        in_specs=[
            pl.BlockSpec((None, T, C), lambda b: (b, 0, 0)),      # x
            pl.BlockSpec((1, C), lambda b: (0, 0)),               # ln1 g
            pl.BlockSpec((1, C), lambda b: (0, 0)),               # ln1 b
            pl.BlockSpec((3 * C, C), lambda b: (0, 0)),           # Wqkv^T
            pl.BlockSpec((3 * C, 1), lambda b: (0, 0)),           # bqkv (col)
            pl.BlockSpec((C, C), lambda b: (0, 0)),               # Wproj
            pl.BlockSpec((1, C), lambda b: (0, 0)),               # bproj
        ],
        out_specs=pl.BlockSpec((None, T, C), lambda b: (b, 0, 0)),
        scratch_shapes=[pltpu.VMEM((3 * C, T), jnp.float32),
                        pltpu.VMEM((C, T), jnp.float32)],
        compiler_params=_cparams(("parallel",)),
    )(x3, blk["ln1"]["g"].reshape(1, C), blk["ln1"]["b"].reshape(1, C),
      a["w_qkv_t"], a["b_qkv"].reshape(3 * C, 1), a["w_proj"],
      a["b_proj"].reshape(1, C))
    return out.reshape(B * T, C)


def fused_basic_attn(x_flat, zk_t, ln_f, post, B, T, C, n_head):
    hd = C // n_head
    assert C % n_head == 0 and hd % 8 == 0, "head_dim must be a multiple of 8"
    a = post["attn"]
    x3 = x_flat.reshape(B, T, C)
    kernel = functools.partial(_basic_attn_kernel, n_head=n_head, head_dim=hd,
                               scale=1.0 / math.sqrt(hd))
    out = pl.pallas_call(
        kernel,
        out_shape=jax.ShapeDtypeStruct((B, T, C), jnp.bfloat16),
        grid=(B,),
        in_specs=[
            pl.BlockSpec((None, T, C), lambda b: (b, 0, 0)),      # x (pre-ln_f)
            pl.BlockSpec((None, C, T), lambda b: (b, 0, 0)),      # z_k^T
            pl.BlockSpec((1, C), lambda b: (0, 0)),               # ln_f g
            pl.BlockSpec((1, C), lambda b: (0, 0)),               # ln_f b
            pl.BlockSpec((1, C), lambda b: (0, 0)),               # ln1 g
            pl.BlockSpec((1, C), lambda b: (0, 0)),               # ln1 b
            pl.BlockSpec((C, C), lambda b: (0, 0)),               # Wq^T
            pl.BlockSpec((C, 1), lambda b: (0, 0)),               # bq (col)
            pl.BlockSpec((C, C), lambda b: (0, 0)),               # Wproj
            pl.BlockSpec((1, C), lambda b: (0, 0)),               # bproj
        ],
        out_specs=pl.BlockSpec((None, T, C), lambda b: (b, 0, 0)),
        scratch_shapes=[pltpu.VMEM((C, T), jnp.float32),
                        pltpu.VMEM((C, T), jnp.float32)],
        compiler_params=_cparams(("parallel",)),
    )(x3, zk_t, ln_f["g"].reshape(1, C), ln_f["b"].reshape(1, C),
      post["ln1"]["g"].reshape(1, C), post["ln1"]["b"].reshape(1, C),
      a["w_q_t"], a["b_q"].reshape(C, 1), a["w_proj"], a["b_proj"].reshape(1, C))
    return out.reshape(B * T, C)


def ln_mlp_residual(x, g, b, w1, b1, w2, b2, *, block_m=512):
    M, C = x.shape
    H = w1.shape[1]
    tm = min(block_m, M)
    return pl.pallas_call(
        _ln_mlp_res_kernel,
        out_shape=jax.ShapeDtypeStruct((M, C), jnp.bfloat16),
        grid=(pl.cdiv(M, tm),),
        in_specs=[
            pl.BlockSpec((tm, C), lambda i: (i, 0)),
            pl.BlockSpec((1, C), lambda i: (0, 0)),
            pl.BlockSpec((1, C), lambda i: (0, 0)),
            pl.BlockSpec((C, H), lambda i: (0, 0)),
            pl.BlockSpec((1, H), lambda i: (0, 0)),
            pl.BlockSpec((H, C), lambda i: (0, 0)),
            pl.BlockSpec((1, C), lambda i: (0, 0)),
        ],
        out_specs=pl.BlockSpec((tm, C), lambda i: (i, 0)),
        compiler_params=_cparams(("parallel",)),
    )(x, g.reshape(1, C), b.reshape(1, C), w1, b1.reshape(1, H), w2,
      b2.reshape(1, C))


def ln_head(x, g, b, head_w, *, block_m=512, block_n=1024):
    M, C = x.shape
    V = head_w.shape[1]
    tm = min(block_m, M)
    tn = min(block_n, V)
    return pl.pallas_call(
        _ln_head_kernel,
        out_shape=jax.ShapeDtypeStruct((M, V), jnp.float32),
        grid=(pl.cdiv(M, tm), pl.cdiv(V, tn)),
        in_specs=[
            pl.BlockSpec((tm, C), lambda i, j: (i, 0)),
            pl.BlockSpec((1, C), lambda i, j: (0, 0)),
            pl.BlockSpec((1, C), lambda i, j: (0, 0)),
            pl.BlockSpec((C, tn), lambda i, j: (0, j)),
        ],
        out_specs=pl.BlockSpec((tm, tn), lambda i, j: (i, j)),
        compiler_params=_cparams(("parallel", "parallel")),
    )(x, g.reshape(1, C), b.reshape(1, C), head_w)


def ln_head_with_loss(x, g, b, head_w, targets, *, block_m=512, block_n=1024):
    M, C = x.shape
    V = head_w.shape[1]
    tm = min(block_m, M)
    tn = min(block_n, V)
    t2 = targets.reshape(M, 1).astype(jnp.int32)
    logits, loss = pl.pallas_call(
        _ln_head_loss_kernel,
        out_shape=(jax.ShapeDtypeStruct((M, V), jnp.float32),
                   jax.ShapeDtypeStruct((M, 1), jnp.float32)),
        grid=(pl.cdiv(M, tm), pl.cdiv(V, tn)),
        in_specs=[
            pl.BlockSpec((tm, C), lambda i, j: (i, 0)),
            pl.BlockSpec((1, C), lambda i, j: (0, 0)),
            pl.BlockSpec((1, C), lambda i, j: (0, 0)),
            pl.BlockSpec((C, tn), lambda i, j: (0, j)),
            pl.BlockSpec((tm, 1), lambda i, j: (i, 0)),
        ],
        out_specs=(pl.BlockSpec((tm, tn), lambda i, j: (i, j)),
                   pl.BlockSpec((tm, 1), lambda i, j: (i, 0))),
        scratch_shapes=[pltpu.VMEM((tm, 1), jnp.float32)] * 3,
        compiler_params=_cparams(("parallel", "arbitrary")),
    )(x, g.reshape(1, C), b.reshape(1, C), head_w, t2)
    return logits, loss[:, 0]


# ----------------------------------------------------------------------------
# Model forward (glue = embedding gather, reshapes; everything else in Pallas)
# ----------------------------------------------------------------------------
def decoder_forward(params, idx, z_k, z_v, targets=None):
    B, T = idx.shape
    C = params["tok_emb"].shape[1]
    H = params["n_head"]
    assert T <= params["block_size"], "block size exhausted"

    tok = jnp.take(params["tok_emb"], idx, axis=0)            # (B, T, C) gather
    pos = params["pos_emb"][:, :T, :]                         # (1, T, C)
    x = (tok + pos).astype(jnp.bfloat16).reshape(B * T, C)    # dropout = identity

    for blk in params["blocks"]:
        x = fused_block_attn(x, blk, B, T, C, H)              # LN1+QKV+MHA+proj+res
        x = ln_mlp_residual(x, blk["ln2"]["g"], blk["ln2"]["b"],
                            blk["mlp"]["w1"], blk["mlp"]["b1"],
                            blk["mlp"]["w2"], blk["mlp"]["b2"])

    # ln_f is fused into the BasicAttention kernel; z_v is unused (reference).
    zk_t = jnp.swapaxes(z_k, 1, 2).astype(jnp.bfloat16)       # (B, C, T)
    post = params["post"]
    x = fused_basic_attn(x, zk_t, params["ln_f"], post, B, T, C, H)
    x = ln_mlp_residual(x, post["ln2"]["g"], post["ln2"]["b"],
                        post["mlp"]["w1"], post["mlp"]["b1"],
                        post["mlp"]["w2"], post["mlp"]["b2"])

    lnp = params["ln_f_post"]
    if targets is None:
        logits = ln_head(x, lnp["g"], lnp["b"], params["head_w"])
        return logits.reshape(B, T, -1), None, None, None, None

    logits, loss = ln_head_with_loss(x, lnp["g"], lnp["b"], params["head_w"],
                                     targets)
    return logits.reshape(B, T, -1), loss, None, None, None


# ----------------------------------------------------------------------------
# Deterministic parameter init (mirrors Decoder.__init__ / _init_weights).
# Matmul weights bf16 (f32 accumulation in-kernel); LN params / biases /
# embedding table f32.  QKV and Q weights are stored pre-transposed (out, in)
# so the kernels can keep q/k/v in a sublane-sliceable (rows=channels) layout.
# ----------------------------------------------------------------------------
def init_params(key, vocab_size, block_size, n_embd, n_head, n_layer,
                *, w_dtype=jnp.bfloat16):
    C = n_embd
    keys = iter(jax.random.split(key, 1024))

    def nrm(shape, dtype=w_dtype):
        return (0.02 * jax.random.normal(next(keys), shape, jnp.float32)).astype(dtype)

    def ln():
        return {"g": jnp.ones((C,), jnp.float32), "b": jnp.zeros((C,), jnp.float32)}

    def mlp_p():
        return {"w1": nrm((C, 4 * C)), "b1": jnp.zeros((4 * C,), jnp.float32),
                "w2": nrm((4 * C, C)), "b2": jnp.zeros((C,), jnp.float32)}

    def block_p():
        return {"ln1": ln(), "ln2": ln(),
                "attn": {"w_qkv_t": nrm((3 * C, C)),   # rows = [q; k; v] channels
                         "b_qkv": jnp.zeros((3 * C,), jnp.float32),
                         "w_proj": nrm((C, C)),
                         "b_proj": jnp.zeros((C,), jnp.float32)},
                "mlp": mlp_p()}

    post = {"ln1": ln(), "ln2": ln(),
            "attn": {"w_q_t": nrm((C, C)),
                     "b_q": jnp.zeros((C,), jnp.float32),
                     "w_proj": nrm((C, C)),
                     "b_proj": jnp.zeros((C,), jnp.float32)},
            "mlp": mlp_p()}

    return {
        "tok_emb": nrm((vocab_size, C), jnp.float32),
        "pos_emb": jnp.zeros((1, block_size, C), jnp.float32),
        "blocks": [block_p() for _ in range(n_layer)],
        "ln_f": ln(),
        "post": post,
        "ln_f_post": ln(),
        "head_w": nrm((C, vocab_size)),
        "n_head": n_head,
        "block_size": block_size,
    }


# ----------------------------------------------------------------------------
if __name__ == "__main__":
    vocab_size, block_size, n_embd, n_head, n_layer = 32, 8, 32, 4, 2
    B, T = 2, 8

    key = jax.random.PRNGKey(0)
    k_idx, k_zk, k_zv, k_tgt, k_params = jax.random.split(key, 5)

    idx = jax.random.randint(k_idx, (B, T), 0, vocab_size, dtype=jnp.int32)
    z_k = jax.random.normal(k_zk, (B, T, n_embd), jnp.float32)
    z_v = jax.random.normal(k_zv, (B, T, n_embd), jnp.float32)
    targets = jax.random.randint(k_tgt, (B, T), 0, vocab_size, dtype=jnp.int32)

    params = init_params(k_params, vocab_size, block_size, n_embd, n_head, n_layer)

    # Inference path (no targets).
    logits, loss, _, _, _ = decoder_forward(params, idx, z_k, z_v)
    jax.block_until_ready(logits)
    assert logits.shape == (B, T, vocab_size)
    assert loss is None
    assert bool(jnp.all(jnp.isfinite(logits)))

    # Training path: fused cross-entropy in the head kernel.
    logits_t, loss_t, _, _, _ = decoder_forward(params, idx, z_k, z_v,
                                                targets=targets)
    jax.block_until_ready(loss_t)
    assert loss_t.shape == (B * T,)
    assert bool(jnp.all(jnp.isfinite(loss_t)))
    lf = logits_t.reshape(-1, vocab_size)
    ref_loss = -jnp.take_along_axis(jax.nn.log_softmax(lf, axis=-1),
                                    targets.reshape(-1, 1), axis=-1)[:, 0]
    assert bool(jnp.allclose(loss_t, ref_loss, atol=5e-3, rtol=5e-3))

    print("KERNEL_OK")
</pallas_src>

<mosaic_0001>
module attributes {stable_mosaic.version = 11 : i64} {
  func.func @_block_attn_kernel(%arg0: i32, %arg1: memref<1x8x32xbf16, #tpu.memory_space<vmem>>, %arg2: memref<1x32xf32, #tpu.memory_space<vmem>>, %arg3: memref<1x32xf32, #tpu.memory_space<vmem>>, %arg4: memref<96x32xbf16, #tpu.memory_space<vmem>>, %arg5: memref<96x1xf32, #tpu.memory_space<vmem>>, %arg6: memref<32x32xbf16, #tpu.memory_space<vmem>>, %arg7: memref<1x32xf32, #tpu.memory_space<vmem>>, %arg8: memref<1x8x32xbf16, #tpu.memory_space<vmem>>, %arg9: memref<96x8xf32, #tpu.memory_space<vmem>>, %arg10: memref<32x8xf32, #tpu.memory_space<vmem>>) attributes {dimension_semantics = [#tpu.dimension_semantics<parallel>], iteration_bounds = array<i64: 2>, scalar_prefetch = 0 : i64, scratch_operands = 2 : i64, tpu.core_type = #tpu.core_type<tc>, window_params = [{transform_indices = @transform_0, window_bounds = array<i64: 1, 8, 32>}, {pipeline_mode = #tpu.pipeline_mode<synchronous>, transform_indices = @transform_1, window_bounds = array<i64: 1, 32>}, {pipeline_mode = #tpu.pipeline_mode<synchronous>, transform_indices = @transform_2, window_bounds = array<i64: 1, 32>}, {pipeline_mode = #tpu.pipeline_mode<synchronous>, transform_indices = @transform_3, window_bounds = array<i64: 96, 32>}, {pipeline_mode = #tpu.pipeline_mode<synchronous>, transform_indices = @transform_4, window_bounds = array<i64: 96, 1>}, {pipeline_mode = #tpu.pipeline_mode<synchronous>, transform_indices = @transform_5, window_bounds = array<i64: 32, 32>}, {pipeline_mode = #tpu.pipeline_mode<synchronous>, transform_indices = @transform_6, window_bounds = array<i64: 1, 32>}, {transform_indices = @transform_7, window_bounds = array<i64: 1, 8, 32>}]} {
    %c0 = arith.constant 0 : index
    %c0_0 = arith.constant 0 : index
    %c0_1 = arith.constant 0 : index
    %0 = vector.load %arg1[%c0, %c0_0, %c0_1] : memref<1x8x32xbf16, #tpu.memory_space<vmem>>, vector<1x8x32xbf16>
    %1 = vector.shape_cast %0 : vector<1x8x32xbf16> to vector<8x32xbf16>
    %2 = arith.extf %1 : vector<8x32xbf16> to vector<8x32xf32>
    %c0_2 = arith.constant 0 : index
    %c0_3 = arith.constant 0 : index
    %3 = vector.load %arg2[%c0_2, %c0_3] : memref<1x32xf32, #tpu.memory_space<vmem>>, vector<1x32xf32>
    %c0_4 = arith.constant 0 : index
    %c0_5 = arith.constant 0 : index
    %4 = vector.load %arg3[%c0_4, %c0_5] : memref<1x32xf32, #tpu.memory_space<vmem>>, vector<1x32xf32>
    %cst = arith.constant dense<0.000000e+00> : vector<8xf32>
    %5 = vector.multi_reduction <add>, %2, %cst [1] : vector<8x32xf32> to vector<8xf32>
    %6 = vector.shape_cast %5 : vector<8xf32> to vector<8x1xf32>
    %cst_6 = arith.constant 3.200000e+01 : f32
    %7 = vector.broadcast %cst_6 : f32 to vector<8x1xf32>
    %8 = arith.divf %6, %7 : vector<8x1xf32>
    %9 = vector.broadcast %8 : vector<8x1xf32> to vector<8x32xf32>
    %10 = arith.subf %2, %9 : vector<8x32xf32>
    %11 = arith.mulf %10, %10 : vector<8x32xf32>
    %cst_7 = arith.constant dense<0.000000e+00> : vector<8xf32>
    %12 = vector.multi_reduction <add>, %11, %cst_7 [1] : vector<8x32xf32> to vector<8xf32>
    %13 = vector.shape_cast %12 : vector<8xf32> to vector<8x1xf32>
    %cst_8 = arith.constant 3.200000e+01 : f32
    %14 = vector.broadcast %cst_8 : f32 to vector<8x1xf32>
    %15 = arith.divf %13, %14 : vector<8x1xf32>
    %16 = vector.broadcast %8 : vector<8x1xf32> to vector<8x32xf32>
    %17 = arith.subf %2, %16 : vector<8x32xf32>
    %cst_9 = arith.constant 9.99999974E-6 : f32
    %18 = vector.broadcast %cst_9 : f32 to vector<8x1xf32>
    %19 = arith.addf %15, %18 : vector<8x1xf32>
    %20 = math.rsqrt %19 : vector<8x1xf32>
    %21 = vector.broadcast %20 : vector<8x1xf32> to vector<8x32xf32>
    %22 = arith.mulf %17, %21 : vector<8x32xf32>
    %23 = vector.broadcast %3 : vector<1x32xf32> to vector<8x32xf32>
    %24 = arith.mulf %22, %23 : vector<8x32xf32>
    %25 = vector.broadcast %4 : vector<1x32xf32> to vector<8x32xf32>
    %26 = arith.addf %24, %25 : vector<8x32xf32>
    %c0_10 = arith.constant 0 : index
    %c0_11 = arith.constant 0 : index
    %27 = vector.load %arg4[%c0_10, %c0_11] : memref<96x32xbf16, #tpu.memory_space<vmem>>, vector<96x32xbf16>
    %28 = arith.truncf %26 : vector<8x32xf32> to vector<8x32xbf16>
    %cst_12 = arith.constant dense<0.000000e+00> : vector<96x8xf32>
    %29 = tpu.matmul %27, %28, %cst_12 {dimension_numbers = #tpu.dot_dimension_numbers<[1], [1], [0], [0], [0, 0, 1, 0], [], []>} : vector<96x32xbf16>, vector<8x32xbf16>, vector<96x8xf32> -> vector<96x8xf32>
    %c0_13 = arith.constant 0 : index
    %c0_14 = arith.constant 0 : index
    %30 = vector.load %arg5[%c0_13, %c0_14] : memref<96x1xf32, #tpu.memory_space<vmem>>, vector<96x1xf32>
    %31 = vector.broadcast %30 : vector<96x1xf32> to vector<96x8xf32>
    %32 = arith.addf %29, %31 : vector<96x8xf32>
    %c0_15 = arith.constant 0 : index
    %c0_16 = arith.constant 0 : index
    %33 = vector.load %arg9[%c0_15, %c0_16] : memref<96x8xf32, #tpu.memory_space<vmem>>, vector<96x8xf32>
    tpu.vector_store %arg9[%c0_15, %c0_16], %32 {strides = array<i32>} : memref<96x8xf32, #tpu.memory_space<vmem>>, vector<96x8xf32>,
    %34 = tpu.iota {dimensions = array<i32: 0>} : vector<8x8xi32>
    %35 = tpu.iota {dimensions = array<i32: 1>} : vector<8x8xi32>
    %36 = arith.cmpi sle, %35, %34 : vector<8x8xi32>
    %c0_i32 = arith.constant 0 : i32
    %c4_i32 = arith.constant 4 : i32
    %37 = arith.addi %c0_i32, %c4_i32 : i32
    %c1_i32 = arith.constant 1 : i32
    scf.for %arg11 = %c0_i32 to %37 step %c1_i32  : i32 {
      %c1_i32_28 = arith.constant 1 : i32
      %51 = arith.muli %arg11, %c1_i32_28 : i32
      %c0_i32_29 = arith.constant 0 : i32
      %52 = arith.addi %c0_i32_29, %51 : i32
      %c8_i32 = arith.constant 8 : i32
      %53 = arith.muli %52, %c8_i32 : i32
      %54 = tpu.assume_multiple %53, 8 : i32
      %c32_i32 = arith.constant 32 : i32
      %55 = arith.addi %c32_i32, %53 : i32
      %56 = tpu.assume_multiple %55, 8 : i32
      %c64_i32 = arith.constant 64 : i32
      %57 = arith.addi %c64_i32, %53 : i32
      %58 = tpu.assume_multiple %57, 8 : i32
      %59 = arith.index_cast %54 : i32 to index
      %c0_30 = arith.constant 0 : index
      %60 = vector.load %arg9[%59, %c0_30] : memref<96x8xf32, #tpu.memory_space<vmem>>, vector<8x8xf32>
      %61 = tpu.transpose %60, [1, 0] : vector<8x8xf32> -> vector<8x8xf32>
      %62 = arith.truncf %61 : vector<8x8xf32> to vector<8x8xbf16>
      %63 = arith.index_cast %56 : i32 to index
      %c0_31 = arith.constant 0 : index
      %64 = vector.load %arg9[%63, %c0_31] : memref<96x8xf32, #tpu.memory_space<vmem>>, vector<8x8xf32>
      %65 = arith.truncf %64 : vector<8x8xf32> to vector<8x8xbf16>
      %66 = arith.index_cast %58 : i32 to index
      %c0_32 = arith.constant 0 : index
      %67 = vector.load %arg9[%66, %c0_32] : memref<96x8xf32, #tpu.memory_space<vmem>>, vector<8x8xf32>
      %68 = arith.truncf %67 : vector<8x8xf32> to vector<8x8xbf16>
      %cst_33 = arith.constant dense<0.000000e+00> : vector<8x8xf32>
      %69 = tpu.matmul %62, %65, %cst_33 {dimension_numbers = #tpu.dot_dimension_numbers<[1], [0], [0], [1], [0, 0, 1, 1], [], []>} : vector<8x8xbf16>, vector<8x8xbf16>, vector<8x8xf32> -> vector<8x8xf32>
      %cst_34 = arith.constant 0.353553385 : f32
      %70 = vector.broadcast %cst_34 : f32 to vector<8x8xf32>
      %71 = arith.mulf %69, %70 : vector<8x8xf32>
      %cst_35 = arith.constant -1.000000e+30 : f32
      %72 = vector.broadcast %cst_35 : f32 to vector<8x8xf32>
      %73 = arith.select %36, %71, %72 : vector<8x8xi1>, vector<8x8xf32>
      %cst_36 = arith.constant dense<0xFF800000> : vector<8xf32>
      %74 = vector.multi_reduction <maximumf>, %73, %cst_36 [1] : vector<8x8xf32> to vector<8xf32>
      %75 = vector.shape_cast %74 : vector<8xf32> to vector<8x1xf32>
      %76 = vector.broadcast %75 : vector<8x1xf32> to vector<8x8xf32>
      %77 = arith.subf %73, %76 : vector<8x8xf32>
      %78 = math.exp %77 : vector<8x8xf32>
      %cst_37 = arith.constant dense<0.000000e+00> : vector<8xf32>
      %79 = vector.multi_reduction <add>, %78, %cst_37 [1] : vector<8x8xf32> to vector<8xf32>
      %80 = vector.shape_cast %79 : vector<8xf32> to vector<8x1xf32>
      %81 = tpu.reciprocal %80 {approx = true} : vector<8x1xf32> -> vector<8x1xf32>
      %82 = vector.broadcast %81 : vector<8x1xf32> to vector<8x8xf32>
      %83 = arith.mulf %78, %82 : vector<8x8xf32>
      %84 = arith.truncf %83 : vector<8x8xf32> to vector<8x8xbf16>
      %cst_38 = arith.constant dense<0.000000e+00> : vector<8x8xf32>
      %85 = tpu.matmul %68, %84, %cst_38 {dimension_numbers = #tpu.dot_dimension_numbers<[1], [1], [0], [0], [0, 0, 1, 0], [], []>} : vector<8x8xbf16>, vector<8x8xbf16>, vector<8x8xf32> -> vector<8x8xf32>
      %86 = arith.index_cast %54 : i32 to index
      %c0_39 = arith.constant 0 : index
      %87 = vector.load %arg10[%86, %c0_39] : memref<32x8xf32, #tpu.memory_space<vmem>>, vector<8x8xf32>
      tpu.vector_store %arg10[%86, %c0_39], %85 {strides = array<i32>} : memref<32x8xf32, #tpu.memory_space<vmem>>, vector<8x8xf32>,
    }
    %c4_i32_17 = arith.constant 4 : i32
    %c0_18 = arith.constant 0 : index
    %c0_19 = arith.constant 0 : index
    %38 = vector.load %arg10[%c0_18, %c0_19] : memref<32x8xf32, #tpu.memory_space<vmem>>, vector<32x8xf32>
    %39 = tpu.transpose %38, [1, 0] : vector<32x8xf32> -> vector<8x32xf32>
    %40 = arith.truncf %39 : vector<8x32xf32> to vector<8x32xbf16>
    %c0_20 = arith.constant 0 : index
    %c0_21 = arith.constant 0 : index
    %41 = vector.load %arg6[%c0_20, %c0_21] : memref<32x32xbf16, #tpu.memory_space<vmem>>, vector<32x32xbf16>
    %cst_22 = arith.constant dense<0.000000e+00> : vector<8x32xf32>
    %42 = tpu.matmul %40, %41, %cst_22 {dimension_numbers = #tpu.dot_dimension_numbers<[1], [0], [0], [1], [0, 0, 1, 1], [], []>} : vector<8x32xbf16>, vector<32x32xbf16>, vector<8x32xf32> -> vector<8x32xf32>
    %43 = arith.addf %2, %42 : vector<8x32xf32>
    %c0_23 = arith.constant 0 : index
    %c0_24 = arith.constant 0 : index
    %44 = vector.load %arg7[%c0_23, %c0_24] : memref<1x32xf32, #tpu.memory_space<vmem>>, vector<1x32xf32>
    %45 = vector.broadcast %44 : vector<1x32xf32> to vector<8x32xf32>
    %46 = arith.addf %43, %45 : vector<8x32xf32>
    %47 = arith.truncf %46 : vector<8x32xf32> to vector<8x32xbf16>
    %c0_25 = arith.constant 0 : index
    %c0_26 = arith.constant 0 : index
    %c0_27 = arith.constant 0 : index
    %48 = vector.load %arg8[%c0_25, %c0_26, %c0_27] : memref<1x8x32xbf16, #tpu.memory_space<vmem>>, vector<1x8x32xbf16>
    %49 = vector.shape_cast %48 : vector<1x8x32xbf16> to vector<8x32xbf16>
    %50 = vector.shape_cast %47 : vector<8x32xbf16> to vector<1x8x32xbf16>
    tpu.vector_store %arg8[%c0_25, %c0_26, %c0_27], %50 {strides = array<i32>} : memref<1x8x32xbf16, #tpu.memory_space<vmem>>, vector<1x8x32xbf16>,
    return
  }
  func.func @transform_0(%arg0: i32) -> (i32, i32, i32) {
    %c0_i32 = arith.constant 0 : i32
    %c0_i32_0 = arith.constant 0 : i32
    %c0_i32_1 = arith.constant 0 : i32
    return %arg0, %c0_i32, %c0_i32_0 : i32, i32, i32
  }
  func.func @transform_1(%arg0: i32) -> (i32, i32) {
    %c0_i32 = arith.constant 0 : i32
    %c0_i32_0 = arith.constant 0 : i32
    %c0_i32_1 = arith.constant 0 : i32
    return %c0_i32, %c0_i32_0 : i32, i32
  }
  func.func @transform_2(%arg0: i32) -> (i32, i32) {
    %c0_i32 = arith.constant 0 : i32
    %c0_i32_0 = arith.constant 0 : i32
    %c0_i32_1 = arith.constant 0 : i32
    return %c0_i32, %c0_i32_0 : i32, i32
  }
  func.func @transform_3(%arg0: i32) -> (i32, i32) {
    %c0_i32 = arith.constant 0 : i32
    %c0_i32_0 = arith.constant 0 : i32
    %c0_i32_1 = arith.constant 0 : i32
    return %c0_i32, %c0_i32_0 : i32, i32
  }
  func.func @transform_4(%arg0: i32) -> (i32, i32) {
    %c0_i32 = arith.constant 0 : i32
    %c0_i32_0 = arith.constant 0 : i32
    %c0_i32_1 = arith.constant 0 : i32
    return %c0_i32, %c0_i32_0 : i32, i32
  }
  func.func @transform_5(%arg0: i32) -> (i32, i32) {
    %c0_i32 = arith.constant 0 : i32
    %c0_i32_0 = arith.constant 0 : i32
    %c0_i32_1 = arith.constant 0 : i32
    return %c0_i32, %c0_i32_0 : i32, i32
  }
  func.func @transform_6(%arg0: i32) -> (i32, i32) {
    %c0_i32 = arith.constant 0 : i32
    %c0_i32_0 = arith.constant 0 : i32
    %c0_i32_1 = arith.constant 0 : i32
    return %c0_i32, %c0_i32_0 : i32, i32
  }
  func.func @transform_7(%arg0: i32) -> (i32, i32, i32) {
    %c0_i32 = arith.constant 0 : i32
    %c0_i32_0 = arith.constant 0 : i32
    %c0_i32_1 = arith.constant 0 : i32
    return %arg0, %c0_i32, %c0_i32_0 : i32, i32, i32
  }
}

</mosaic_0001>

<bundles_post_ra>
// kernel: tpu_custom_call.1
= control target key start
LH: loop header
LB: loop body
LE: loop exit
PB: predicated region body
PF: predicated region fallthrough
CT: control target
= control target key end

     0   :  { %12 = vsyncpa [#allocation5], 0  ;;  %s2042_s0 = inlined_call_operand.hbm [shape: bf16[2,8,32], index: 0, kind: input, shape index: {}]   ;;  %s2043_s1 = inlined_call_operand.hbm [shape: f32[1,32], index: 1, kind: input, shape index: {}]   ;;  %s2044_s2 = inlined_call_operand.hbm [shape: f32[1,32], index: 2, kind: input, shape index: {}]   ;;  %s2045_s3 = inlined_call_operand.hbm [shape: bf16[96,32], index: 3, kind: input, shape index: {}]   ;;  %s2046_s4 = inlined_call_operand.hbm [shape: f32[96,1], index: 4, kind: input, shape index: {}]   ;;  %s2047_s5 = inlined_call_operand.hbm [shape: bf16[32,32], index: 5, kind: input, shape index: {}]   ;;  %s2048_s6 = inlined_call_operand.hbm [shape: f32[1,32], index: 6, kind: input, shape index: {}]   ;;  %s2049_s7 = inlined_call_operand.hbm [shape: bf16[2,8,32], index: 7, kind: output, shape index: {}]  }
   0x1   :  { %14 = vsyncpa [#allocation5 + $0x1], 0 }
   0x2   :  { %15 = vsyncpa [#allocation8], 0 }
   0x3   :  { %16 = vsyncpa [#allocation11], 0 }
   0x4   :  { %17 = vsyncpa [#allocation14], 0 }
   0x5   :  { %18 = vsyncpa [#allocation6], 0 }
   0x6   :  { %20 = vsyncpa [#allocation6 + $0x1], 0  ;;  %s1651_s24 = smov 0   ;;  %s1653_s25 = smov 0  }
   0x7   :  { %s1655_s26 = smov 0   ;;  %s1657_s27 = smov 0  }
   0x8 LB: > { %s1594_s28 = smov [#allocation7]   ;;  %s1672_s30 = sadd.s32 4294967295, %s1588_s27   ;;  %s1588_s27 = sphi %s1657_s27, %s2075_s27   ;;  %s1584_s26 = sphi %s1655_s26, %s2074_s26   ;;  %s1580_s25 = sphi %s1653_s25, %s2073_s25   ;;  %s1576_s24 = sphi %s1651_s24, %s2072_s24  }
   0x9   : > { %s222_s29 = sshll.u32 %s1594_s28, 4  ;;  %p1068_p0 = scmp.ge.s32.totalorder %s1588_s27, 1  ;;  %s1677_s29 = int_to_ptr.vmem [resolvable:$true] %s222_s29 }
   0xa   : > { %p2050_p1 = scmp.eq.s32.totalorder %s1672_s30, 0  ;;  %p209_p2 = scmp.lt.s32.totalorder %s1588_s27, 3 }
   0xb   : > { %s1595_s9 = smov [#allocation10]   ;;  %s1596_s12 = smov [#allocation13]  }
   0xc   : > { %p1679_p3 = pnand %p1068_p0, %p209_p2  ;;  %s243_s10 = sshll.u32 %s1595_s9, 4  ;;  %s1686_s10 = int_to_ptr.vmem [resolvable:$true] %s243_s10 }
   0xd   : > { %s269_s13 = sshll.u32 %s1596_s12, 4  ;;  %s1308_s16 = scalar_lea.hbm %s2043_s1, 16  ;;  %s1694_s13 = int_to_ptr.vmem [resolvable:$true] %s269_s13 }
   0xe   : > { %s2053_s8 = scalar_select %p1679_p3, 1, 0 }
   0xf   : > { %p1196_p5 = pneg %p1679_p3  ;;  %p1309_p7 = scmp.ne.s32.totalorder %s2043_s1, %s1308_s16 }
  0x10   : > { %p1315_p11 = scmp.lt.u32.totalorder %s1308_s16, %s2043_s1 }
  0x11   : > { %p1690_p6 = pnand %p1196_p5, %p2050_p1 }
  0x13   : > { %p1704_p8 = pneg %p1690_p6 }
  0x15   : > { %p1311_p9 = pnand %p1704_p8, %p1309_p7 }
  0x17   : > { %p1312_p10 = pneg %p1311_p9 }
  0x19   : > { %p1317_p12 = pnand %p1315_p11, %p1312_p10 }
  0x1b   : > { %1320 = shalt.err (!%p1317_p12)
}
  0x1c   : > { %s1321_s22 = scalar_lea.vmem %s1677_s29, 16  ;;  %s1328_s23 = scalar_lea.vmem %s1677_s29, 32 }
  0x1d   : > { %p1322_p13 = scmp.ne.s32.totalorder %s1677_s29, %s1321_s22  ;;  %p1329_p5 = scmp.lt.s32.totalorder %s1677_s29, %s1677_s29 }
  0x1e   : > { %p1330_p7 = scmp.lt.s32.totalorder %s1328_s23, %s1321_s22 }
  0x1f   : > { %p1324_p0 = pnand %p1322_p13, %p1704_p8 }
  0x20   : > { %p1331_p9 = por %p1330_p7, %p1329_p5 }
  0x21   : > { %p1325_p2 = pneg %p1324_p0 }
  0x23   : > { %p1332_p4 = pnand %p1331_p9, %p1325_p2 }
  0x25   : > { %1335 = shalt.err (!%p1332_p4)
}
  0x26   : > { %1199 = dma.hbm_to_vmem [thread:$0]  (!%p1690_p6), %s2043_s1, 16, %s1677_s29, [#allocation8]  }
  0x27   : > { %s1336_s15 = scalar_lea.hbm %s2045_s3, 768 }
  0x28   : > { %p1337_p10 = scmp.ne.s32.totalorder %s2045_s3, %s1336_s15  ;;  %p1343_p4 = scmp.lt.u32.totalorder %s1336_s15, %s2045_s3 }
  0x2a   : > { %p1339_p11 = pnand %p1337_p10, %p1704_p8 }
  0x2c   : > { %p1340_p12 = pneg %p1339_p11 }
  0x2e   : > { %p1345_p13 = pnand %p1343_p4, %p1340_p12 }
  0x30   : > { %1348 = shalt.err (!%p1345_p13)
}
  0x31   : > { %s1349_s29 = scalar_lea.vmem %s1686_s10, 768  ;;  %p1357_p7 = scmp.lt.s32.totalorder %s1686_s10, %s1686_s10 }
  0x32   : > { %p1350_p0 = scmp.ne.s32.totalorder %s1686_s10, %s1349_s29  ;;  %p1358_p9 = scmp.lt.s32.totalorder %s1349_s29, %s1349_s29 }
  0x34   : > { %p1352_p2 = pnand %p1350_p0, %p1704_p8  ;;  %p1359_p10 = por %p1358_p9, %p1357_p7 }
  0x36   : > { %p1353_p5 = pneg %p1352_p2 }
  0x38   : > { %p1360_p11 = pnand %p1359_p10, %p1353_p5 }
  0x3a   : > { %1363 = shalt.err (!%p1360_p11)
}
  0x3b   : > { %s1597_s21 = smov 64   ;;  %s1598_s22 = smov 4  }
  0x3c   : > { %1205 = dma.hbm_to_vmem [thread:$0]  (!%p1690_p6), %s2045_s3, 768, %s1686_s10, [#allocation11], %s1597_s21, %s1597_s21, %s1598_s22  }
  0x3d   : > { %s1364_s14 = scalar_lea.hbm %s2047_s5, 256 }
  0x3e   : > { %p1365_p12 = scmp.ne.s32.totalorder %s2047_s5, %s1364_s14  ;;  %p1371_p0 = scmp.lt.u32.totalorder %s1364_s14, %s2047_s5 }
  0x40   : > { %p1367_p4 = pnand %p1365_p12, %p1704_p8 }
  0x42   : > { %p1368_p13 = pneg %p1367_p4 }
  0x44   : > { %p1373_p2 = pnand %p1371_p0, %p1368_p13 }
  0x46   : > { %1376 = shalt.err (!%p1373_p2)
}
  0x47   : > { %s1377_s10 = scalar_lea.vmem %s1694_s13, 256  ;;  %p1385_p10 = scmp.lt.s32.totalorder %s1694_s13, %s1694_s13 }
  0x48   : > { %p1378_p5 = scmp.ne.s32.totalorder %s1694_s13, %s1377_s10  ;;  %p1386_p11 = scmp.lt.s32.totalorder %s1377_s10, %s1377_s10 }
  0x4a   : > { %p1380_p7 = pnand %p1378_p5, %p1704_p8  ;;  %p1387_p12 = por %p1386_p11, %p1385_p10 }
  0x4c   : > { %p1381_p9 = pneg %p1380_p7 }
  0x4e   : > { %p1388_p4 = pnand %p1387_p12, %p1381_p9 }
  0x50   : > { %1391 = shalt.err (!%p1388_p4)
}
  0x51   : > { %1211 = dma.hbm_to_vmem [thread:$0]  (!%p1690_p6), %s2047_s5, 256, %s1694_s13, [#allocation14], %s1597_s21, %s1597_s21, %s1598_s22  }
  0x52   : > { %s1599_s23 = smov [#allocation9]   ;;  %s1600_s9 = smov [#allocation12]  }
  0x53   : > { %s233_s28 = sshll.u32 %s1599_s23, 4  ;;  %s256_s12 = sshll.u32 %s1600_s9, 4  ;;  %s234_s28 = int_to_ptr.vmem [resolvable:$true] %s233_s28  ;;  %s257_s12 = int_to_ptr.vmem [resolvable:$true] %s256_s12 }
  0x54   : > { %s1392_s16 = scalar_lea.hbm %s2044_s2, 16 }
  0x55   : > { %p1393_p13 = scmp.ne.s32.totalorder %s2044_s2, %s1392_s16  ;;  %p1399_p5 = scmp.lt.u32.totalorder %s1392_s16, %s2044_s2 }
  0x57   : > { %p1395_p0 = pnand %p1393_p13, %p1704_p8 }
  0x59   : > { %p1396_p2 = pneg %p1395_p0 }
  0x5b   : > { %p1401_p7 = pnand %p1399_p5, %p1396_p2 }
  0x5d   : > { %1404 = shalt.err (!%p1401_p7)
}
  0x5e   : > { %s1405_s13 = scalar_lea.vmem %s234_s28, 16  ;;  %s1412_s21 = scalar_lea.vmem %s234_s28, 32 }
  0x5f   : > { %p1406_p9 = scmp.ne.s32.totalorder %s234_s28, %s1405_s13  ;;  %p1413_p12 = scmp.lt.s32.totalorder %s234_s28, %s234_s28 }
  0x60   : > { %p1414_p4 = scmp.lt.s32.totalorder %s1412_s21, %s1405_s13 }
  0x61   : > { %p1408_p10 = pnand %p1406_p9, %p1704_p8 }
  0x62   : > { %p1415_p1 = por %p1414_p4, %p1413_p12 }
  0x63   : > { %p1409_p11 = pneg %p1408_p10 }
  0x65   : > { %p1416_p3 = pnand %p1415_p1, %p1409_p11 }
  0x67   : > { %1419 = shalt.err (!%p1416_p3)
}
  0x68   : > { %1202 = dma.hbm_to_vmem [thread:$0]  (!%p1690_p6), %s2044_s2, 16, %s234_s28, [#allocation8]  }
  0x69   : > { %s1420_s14 = scalar_lea.hbm %s2046_s4, 1536 }
  0x6a   : > { %p1421_p13 = scmp.ne.s32.totalorder %s2046_s4, %s1420_s14  ;;  %p1427_p3 = scmp.lt.u32.totalorder %s1420_s14, %s2046_s4 }
  0x6c   : > { %p1423_p0 = pnand %p1421_p13, %p1704_p8 }
  0x6e   : > { %p1424_p1 = pneg %p1423_p0 }
  0x70   : > { %p1429_p2 = pnand %p1427_p3, %p1424_p1 }
  0x72   : > { %1432 = shalt.err (!%p1429_p2)
}
  0x73   : > { %s1433_s10 = scalar_lea.vmem %s257_s12, 1536  ;;  %p1441_p10 = scmp.lt.s32.totalorder %s257_s12, %s257_s12 }
  0x74   : > { %p1434_p5 = scmp.ne.s32.totalorder %s257_s12, %s1433_s10  ;;  %p1442_p11 = scmp.lt.s32.totalorder %s1433_s10, %s1433_s10 }
  0x76   : > { %p1436_p7 = pnand %p1434_p5, %p1704_p8  ;;  %p1443_p12 = por %p1442_p11, %p1441_p10 }
  0x78   : > { %p1437_p9 = pneg %p1436_p7 }
  0x7a   : > { %p1444_p4 = pnand %p1443_p12, %p1437_p9 }
  0x7c   : > { %1447 = shalt.err (!%p1444_p4)
}
  0x7d   : > { %s1601_s28 = smov 128   ;;  %s1602_s20 = smov 8  }
  0x7e   : > { %1208 = dma.hbm_to_vmem [thread:$0]  (!%p1690_p6), %s2046_s4, 1536, %s257_s12, [#allocation11], %s1601_s28, %s1601_s28, %s1602_s20  }
  0x7f   : > { %s1603_s22 = smov [#allocation15]   ;;  %s1448_s14 = scalar_lea.hbm %s2048_s6, 16 }
  0x80   : > { %s283_s29 = sshll.u32 %s1603_s22, 4  ;;  %p1449_p13 = scmp.ne.s32.totalorder %s2048_s6, %s1448_s14  ;;  %s284_s29 = int_to_ptr.vmem [resolvable:$true] %s283_s29 }
  0x81   : > { %p1455_p3 = scmp.lt.u32.totalorder %s1448_s14, %s2048_s6 }
  0x82   : > { %p1451_p0 = pnand %p1449_p13, %p1704_p8 }
  0x84   : > { %p1452_p1 = pneg %p1451_p0 }
  0x86   : > { %p1457_p2 = pnand %p1455_p3, %p1452_p1 }
  0x88   : > { %1460 = shalt.err (!%p1457_p2)
}
  0x89   : > { %s1461_s12 = scalar_lea.vmem %s284_s29, 16  ;;  %s1468_s10 = scalar_lea.vmem %s284_s29, 32 }
  0x8a   : > { %p1462_p5 = scmp.ne.s32.totalorder %s284_s29, %s1461_s12  ;;  %p1469_p10 = scmp.lt.s32.totalorder %s284_s29, %s284_s29 }
  0x8b   : > { %p1470_p11 = scmp.lt.s32.totalorder %s1468_s10, %s1461_s12 }
  0x8c   : > { %p1464_p7 = pnand %p1462_p5, %p1704_p8 }
  0x8d   : > { %p1471_p12 = por %p1470_p11, %p1469_p10 }
  0x8e   : > { %p1465_p9 = pneg %p1464_p7 }
  0x90   : > { %p1472_p4 = pnand %p1471_p12, %p1465_p9 }
  0x92   : > { %1475 = shalt.err (!%p1472_p4)
}
  0x93   : > { %1214 = dma.hbm_to_vmem [thread:$0]  (!%p1690_p6), %s2048_s6, 16, %s284_s29, [#allocation14]  }
  0x94   : > { %s1067_s19 = sadd.s32 4294967294, %s1588_s27   ;;  %s1828_s11 = sadd.s32 1, %s1588_s27  }
  0x95   : > { %s30_s13 = ssub.s32 %s1588_s27, %s1828_s11  ;;  %s33_s21 = sadd.s32 1, %s1584_s26 }
  0x96   : > { %p31_p8 = scmp.eq.s32.totalorder %s30_s13, 0  ;;  %p40_p13 = scmp.ne.s32.totalorder %s1584_s26, %s1580_s25 }
  0x97   : > { %p41_p0 = scmp.eq.s32.totalorder %s1588_s27, 0  ;;  %p46_p1 = scmp.ne.s32.totalorder %s1580_s25, %s1576_s24 }
  0x98   : > { %s1839_s22 = scalar_select %p31_p8, %s1584_s26, %s33_s21  }
  0x99   : > { %p1841_p3 = por %p41_p0, %p40_p13  ;;  %p2057_p2 = scmp.eq.s32.totalorder %s1672_s30, 0 }
  0x9a   : > { %p196_p5 = scmp.eq.s32.totalorder %s1672_s30, 1  ;;  %p202_p7 = scmp.eq.s32.totalorder %s1067_s19, 1 }
  0x9b   : > { %p1847_p6 = por %p2057_p2, %p46_p1  ;;  %p1229_p9 = scmp.lt.s32.totalorder %s1588_s27, 2 }
  0x9c   : > { %s294_s9 = sand.u32 1, %s1584_s26   ;;  %p1854_p10 = por %p196_p5, %p40_p13 }
  0x9d   : > { %p1858_p11 = por %p202_p7, %p46_p1  ;;  %s1076_s16 = sshll.u32 %s294_s9, 2 }
  0x9e   : > { %s2059_s14 = scalar_select %p1854_p10, 1, 0 }
  0x9f   : > { %s2060_s15 = scalar_select %p1858_p11, 1, 0 }
  0xa0   : > { %s1077_s17 = sshll.u32 %s1588_s27, 6  ;;  %s298_s28 = scalar_lea.vmem [#allocation4], %s1076_s16 }
  0xa1   : > { %s1866_s10 = scalar_lea.hbm %s2042_s0, %s1077_s17  ;;  %s305_s20 = sshll.u32 %s298_s28, 4  ;;  %s1868_s20 = int_to_ptr.vmem [resolvable:$true] %s305_s20 }
  0xa2   : > { %p1872_p12 = pnand %p1229_p9, %p1841_p3  ;;  %s295_s13 = scalar_lea.sflag [#allocation5], %s294_s9 }
  0xa3   : > { %s1476_s21 = scalar_lea.hbm %s1866_s10, 64  ;;  %s1481_s18 = scalar_lea.hbm %s2042_s0, 128 }
  0xa4   : > { %p1477_p4 = scmp.ne.s32.totalorder %s1866_s10, %s1476_s21  ;;  %p1478_p8 = pneg %p1872_p12 }
  0xa5   : > { %p1482_p1 = scmp.lt.u32.totalorder %s1866_s10, %s2042_s0  ;;  %p1483_p3 = scmp.lt.u32.totalorder %s1481_s18, %s1476_s21 }
  0xa6   : > { %p1479_p13 = pnand %p1478_p8, %p1477_p4  ;;  %p1485_p5 = scmp.lt.u32.totalorder %s1476_s21, %s1866_s10 }
  0xa7   : > { %p1484_p2 = por %p1483_p3, %p1482_p1 }
  0xa8   : > { %p1480_p0 = pneg %p1479_p13 }
  0xa9   : > { %p1486_p7 = por %p1485_p5, %p1484_p2 }
  0xab   : > { %p1487_p9 = pnand %p1486_p7, %p1480_p0 }
  0xad   : > { %1490 = shalt.err (!%p1487_p9)
}
  0xae   : > { %s1491_s9 = scalar_lea.vmem %s1868_s20, 64  ;;  %s1604_s28 = smov [#allocation4]  }
  0xaf   : > { %p1492_p4 = scmp.ne.s32.totalorder %s1868_s20, %s1491_s9  ;;  %s1496_s16 = sshll.u32 %s1604_s28, 4  ;;  %s1497_s16 = int_to_ptr.vmem [resolvable:$false] %s1496_s16 }
  0xb0   : > { %s1498_s17 = scalar_lea.vmem %s1497_s16, 128  ;;  %p1499_p10 = scmp.lt.s32.totalorder %s1868_s20, %s1497_s16 }
  0xb1   : > { %p1494_p13 = pnand %p1492_p4, %p1478_p8  ;;  %p1500_p1 = scmp.lt.s32.totalorder %s1498_s17, %s1491_s9 }
  0xb3   : > { %p1495_p11 = pneg %p1494_p13  ;;  %p1501_p3 = por %p1500_p1, %p1499_p10 }
  0xb5   : > { %p1502_p2 = pnand %p1501_p3, %p1495_p11 }
  0xb7   : > { %1505 = shalt.err (!%p1502_p2)
}
  0xb8   : > { %1218 = dma.hbm_to_vmem [thread:$0]  (!%p1872_p12), %s1866_s10, 64, %s1868_s20, %s295_s13  }
  0xb9   : > { %p2062_p0 = scmp.ne.s32.totalorder %s2053_s8, 0 }
  0xba   : > { %s1904_s21 = sand.u32 (!%p2062_p0), 1, %s1580_s25  }
  0xbb   : > { %314 = sbr.rel (%p2062_p0) target bundleno = 2017 (0x7e1), region = 48  ;;  %s1079_s18 = sshll.u32 (!%p2062_p0), %s1904_s21, 2 }
  0xbc   : > { %s317_s23 = scalar_lea.sflag (!%p2062_p0), [#allocation5], %s1904_s21  ;;  %s320_s12 = scalar_lea.vmem (!%p2062_p0), [#allocation4], %s1079_s18 }
  0xc2   : > { %1555 = dma.done.wait (%p1847_p6), %s317_s23, 64  }
  0xc3   : > { %1557 = vsyncadd (%p1847_p6), %s317_s23, 4294967232  ;;  %p2063_p10 = scmp.eq.s32.totalorder %s1672_s30, 0 }
  0xc5   : > { %1559 = dma.done.wait (%p2063_p10), [#allocation8], 32   ;;  %p2064_p11 = pmov %p2063_p10 }
  0xc6   : > { %p2065_p12 = pmov %p2063_p10 }
  0xc7   : > { %1561 = vsyncadd (%p2064_p11), [#allocation8], 4294967264 }
  0xc8   : > { %1563 = dma.done.wait (%p2065_p12), [#allocation11], 2304   ;;  %p2066_p8 = pmov %p2063_p10 }
  0xca   : > { %1565 = vsyncadd (%p2066_p8), [#allocation11], 4294964992  ;;  %p2067_p5 = pmov %p2066_p8 }
  0xcc   : > { %1567 = dma.done.wait (%p2067_p5), [#allocation14], 272   ;;  %p2068_p7 = pmov %p2067_p5 }
  0xcd   : > { %vm380_vm0 = vcmask 261120   ;;  %v376_v0 = vld [vmem:[%s320_s12] sm:$0xf]  ;;  %v1294_v8 = vld [vmem:[#allocation10] sm:$0xff]   ;;  %v1605_v11 = vmov 0   ;;  %v425_v14 = vld [vmem:[#allocation12 + $0x18] sm:$0xff]  ;;  %v639_v38 = vlaneseq }
  0xce   : > { %1569 = vsyncadd (%p2068_p7), [#allocation14], 4294967024  ;;  %v1926_v1 = vunpack.c.l.bf16 %v376_v0  ;;  %v1295_v9 = vld [vmem:[#allocation10 + $0x10] sm:$0xff]   ;;  %1132 = vmatprep.mubr.msk.bf16.mxu0 %vm380_vm0, %v1294_v8  ;;  %1292 = vset.pattern.permute.xlu1 %v1605_v11  ;;  %v423_v12 = vld [vmem:[#allocation12 + $0x8] sm:$0xff]  ;;  %vm626_vm2 = vcmask 64512   ;;  %s1961_s8 = scalar_lea.vmem [#allocation16], %s1079_s18 }
  0xcf   : > { %1136 = vmatprep.mubr.msk.bf16.mxu1 %vm380_vm0, %v1295_v9  ;;  %v422_v10 = vld [vmem:[#allocation12] sm:$0xff]  ;;  %1293 = vset.pattern.permute.xlu0 %v1605_v11  ;;  %v424_v13 = vld [vmem:[#allocation12 + $0x10] sm:$0xff]  ;;  %v427_v16 = vld [vmem:[#allocation12 + $0x28] sm:$0xff]  ;;  %v1941_v39 = vshrl.u32 %v639_v38, 7  ;;  %v1943_v40 = vand.u32 127, %v639_v38  ;;  %s1963_s29 = smov 0  }
  0xd0   : > { %v381_v2 = vsel %vm380_vm0, %v1926_v1, 0.0  ;;  %436 = vperm.xlu1 %1292, %v422_v10   ;;  %v426_v15 = vld [vmem:[#allocation12 + $0x20] sm:$0xff]  ;;  %v428_v17 = vld [vmem:[#allocation12 + $0x30] sm:$0xff]  ;;  %v429_v18 = vld [vmem:[#allocation12 + $0x38] sm:$0xff] }
  0xd1   : > { %382 = vadd.xlane.f32.xlu0 %v381_v2  ;;  %v430_v19 = vld [vmem:[#allocation12 + $0x40] sm:$0xff]  ;;  %v431_v20 = vld [vmem:[#allocation12 + $0x48] sm:$0xff]  ;;  %v432_v21 = vld [vmem:[#allocation12 + $0x50] sm:$0xff]  ;;  %vm643_vm1 = vcmp.le.s32.totalorder %v1943_v40, %v1941_v39 }
  0xd2   : > { %v433_v22 = vld [vmem:[#allocation12 + $0x58] sm:$0xff]  ;;  %v1087_v27 = vld [vmem:[#allocation7] ss:$0 sm:$0xff]  ;;  %v1088_v29 = vld [vmem:[#allocation9] ss:$0 sm:$0xff] }
  0xd3   : > { %v1296_v34 = vld [vmem:[#allocation10 + $0x8] sm:$0xff]   ;;  %v1297_v35 = vld [vmem:[#allocation10 + $0x18] sm:$0xff]   ;;  %v1298_v36 = vld [vmem:[#allocation10 + $0x20] sm:$0xff]  }
  0xd4   : > { %441 = vperm.xlu1 %1292, %v423_v12   ;;  %v1299_v37 = vld [vmem:[#allocation10 + $0x28] sm:$0xff]  }
  0xd8   : > { %451 = vperm.xlu1 %1292, %v425_v14  }
  0xdc   : > { %456 = vperm.xlu1 %1292, %v426_v15  }
  0xe0   : > { %461 = vperm.xlu1 %1292, %v427_v16  }
  0xe4   : > { %466 = vperm.xlu1 %1292, %v428_v17  }
  0xe8   : > { %471 = vperm.xlu1 %1292, %v429_v18  }
  0xec   : > { %476 = vperm.xlu1 %1292, %v430_v19  }
  0xf0   : > { %481 = vperm.xlu1 %1292, %v431_v20  }
  0xf4   : > { %486 = vperm.xlu1 %1292, %v432_v21  }
  0xf8   : > { %491 = vperm.xlu1 %1292, %v433_v22  }
 0x14f   : > { %v437_v41 = vpop.permute.xlu1 %436 }
 0x153   : > { %v442_v42 = vpop.permute.xlu1 %441 }
 0x157   : > { %v452_v43 = vpop.permute.xlu1 %451 }
 0x15b   : > { %v457_v44 = vpop.permute.xlu1 %456 }
 0x15e   : > { %v383_v3 = vpop.xlane.xlu0 %382 }
 0x15f   : > { %v385_v4 = vmul.f32 0.03125, %v383_v3  ;;  %v462_v45 = vpop.permute.xlu1 %461 }
 0x161   : > { %v386_v5 = vsub.f32 %v1926_v1, %v385_v4 }
 0x163   : > { %v387_v6 = vmul.f32 %v386_v5, %v386_v5  ;;  %v467_v46 = vpop.permute.xlu1 %466 }
 0x165   : > { %v388_v7 = vsel %vm380_vm0, %v387_v6, 0.0 }
 0x166   : > { %389 = vadd.xlane.f32.xlu0 %v388_v7 }
 0x167   : > { %v472_v47 = vpop.permute.xlu1 %471 }
 0x16b   : > { %v477_v48 = vpop.permute.xlu1 %476 }
 0x16f   : > { %v482_v49 = vpop.permute.xlu1 %481 }
 0x173   : > { %v487_v2 = vpop.permute.xlu1 %486 }
 0x177   : > { %v492_v8 = vpop.permute.xlu1 %491 }
 0x17c   : > { %446 = vperm.xlu0 %1293, %v424_v13  }
 0x1f3   : > { %v390_v23 = vpop.xlane.xlu0 %389 }
 0x1f4   : > { %v391_v24 = vmul.f32 0.03125, %v390_v23 }
 0x1f6   : > { %v392_v25 = vadd.f32 1e-05, %v391_v24 }
 0x1f8   : > { %1300 = vrsqrt.f32 %v392_v25 }
 0x1fb   : > { %v447_v50 = vpop.permute.xlu0 %446 }
 0x202   : > { %v1301_v26 = vpop.eup %1300 }
 0x203   : > { %v394_v28 = vmul.f32 %v1301_v26, %v386_v5 }
 0x205   : > { %v401_v30 = vmul.f32 %v1087_v27, %v394_v28 }
 0x207   : > { %v408_v31 = vadd.f32 %v1088_v29, %v401_v30 }
 0x209   : > { %v421_v32 = vpack.c.bf16 %v408_v31, %v408_v31 }
 0x20b   : > { %1166 = vmatprep.subr.msk.bf16.mxu0 %vm380_vm0, %v421_v32  ;;  %1167 = vmatprep.subr.msk.bf16.mxu1 %vm380_vm0, %v421_v32  ;;  %v543_v33 = vsel %vm380_vm0, %v421_v32, 0 }
 0x20c   : > { %1131 = vmatpush3.bf16.xpose.msra.mxu0 %v543_v33  ;;  %1165 = vmatpush3.bf16.xpose.msra.mxu1 %v543_v33 }
 0x213   : > { %1133 = vmatmul.mubr.msk.bf16.vlgmr.msra.gmra.mrb[0].mxu0 %vm380_vm0, %v1296_v34  ;;  %1137 = vmatmul.mubr.msk.bf16.vlgmr.msra.gmra.mrb[0].mxu1 %vm380_vm0, %v1297_v35 }
 0x214   : > { %1140 = vmatprep.mubr.msk.bf16.mxu1 %vm380_vm0, %v1298_v36 }
 0x21b   : > { %1141 = vmatmul.mubr.msk.bf16.gmra.mrb[4].mxu1 %vm380_vm0, %v1299_v37 }
 0x2e6   : > { %v1134_v51 = vpop.f32.mrb[0].mxu0  ;;  %v1138_v52 = vpop.f32.mrb[0].mxu1 }
 0x2e7   : > { %v604_v53 = vadd.f32 %v1138_v52, %v467_v46  ;;  %v579_v54 = vpop.f32.mrb[1].mxu0  ;;  %v595_v55 = vpop.f32.mrb[1].mxu1  ;;  %v588_v56 = vadd.f32 %v1134_v51, %v447_v50 }
 0x2e8   : > { %v580_v57 = vadd.f32 %v579_v54, %v437_v41  ;;  %v596_v58 = vadd.f32 %v595_v55, %v457_v44  ;;  %v1135_v59 = vpop.f32.mrb[2].mxu0  ;;  %v1139_v60 = vpop.f32.mrb[2].mxu1 }
 0x2e9   : > { %633 = vst.msk [vmem:[#allocation2 + $0x30] sm:$0xff] %vm626_vm2, %v604_v53  ;;  %v591_v61 = vadd.f32 %v1135_v59, %v452_v43  ;;  %v607_v62 = vadd.f32 %v1139_v60, %v472_v47  ;;  %v582_v63 = vpop.f32.mrb[3].mxu0  ;;  %v598_v0 = vpop.f32.mrb[3].mxu1  ;;  %629 = vst.msk [vmem:[#allocation2 + $0x10] sm:$0xff] %vm626_vm2, %v588_v56 }
 0x2ea   : > { %627 = vst.msk [vmem:[#allocation2] sm:$0xff] %vm626_vm2, %v580_v57  ;;  %631 = vst.msk [vmem:[#allocation2 + $0x20] sm:$0xff] %vm626_vm2, %v596_v58  ;;  %v583_v3 = vadd.f32 %v582_v63, %v442_v42  ;;  %v599_v4 = vadd.f32 %v598_v0, %v462_v45 }
 0x2eb   : > { %630 = vst.msk [vmem:[#allocation2 + $0x18] sm:$0xff] %vm626_vm2, %v591_v61  ;;  %634 = vst.msk [vmem:[#allocation2 + $0x38] sm:$0xff] %vm626_vm2, %v607_v62 }
 0x2ec   : > { %628 = vst.msk [vmem:[#allocation2 + $0x8] sm:$0xff] %vm626_vm2, %v583_v3  ;;  %632 = vst.msk [vmem:[#allocation2 + $0x28] sm:$0xff] %vm626_vm2, %v599_v4 }
 0x2ee   : > { %v1142_v5 = vpop.f32.mrb[4].mxu1 }
 0x2ef   : > { %v620_v6 = vadd.f32 %v1142_v5, %v487_v2  ;;  %v611_v7 = vpop.f32.mrb[5].mxu1 }
 0x2f0   : > { %v612_v9 = vadd.f32 %v611_v7, %v477_v48  ;;  %v1143_v10 = vpop.f32.mrb[6].mxu1 }
 0x2f1   : > { %637 = vst.msk [vmem:[#allocation2 + $0x50] sm:$0xff] %vm626_vm2, %v620_v6  ;;  %v623_v11 = vadd.f32 %v1143_v10, %v492_v8  ;;  %v614_v12 = vpop.f32.mrb[7].mxu1 }
 0x2f2   : > { %635 = vst.msk [vmem:[#allocation2 + $0x40] sm:$0xff] %vm626_vm2, %v612_v9  ;;  %v615_v13 = vadd.f32 %v614_v12, %v482_v49 }
 0x2f3   : > { %638 = vst.msk [vmem:[#allocation2 + $0x58] sm:$0xff] %vm626_vm2, %v623_v11 }
 0x2f4   : > { %636 = vst.msk [vmem:[#allocation2 + $0x48] sm:$0xff] %vm626_vm2, %v615_v13 }
 0x2f5 LB: >> { %v1606_v14 = vmov 0.0   ;;  %s1101_s10 = sshll.u32 %s1592_s29, 3  ;;  %vm697_vm3 = vcmask 1043456   ;;  %vm1607_vm4 = vmmov 0   ;;  %s649_s29 = sadd.s32 1, %s1592_s29   ;;  %s1592_s29 = sphi %s1963_s29, %s649_s29  }
 0x2f6   : >> { %1144 = vmatprep.subr.bf16.mxu0 %v1606_v14  ;;  %1150 = vmatprep.subr.bf16.mxu1 %v1606_v14  ;;  %s1971_s20 = scalar_lea.vmem [#allocation2], %s1101_s10  ;;  %s801_s19 = scalar_lea.vmem [#allocation3], %s1101_s10 }
 0x2f7   : >> { %1146 = vmatprep.mubr.msk.bf16.mxu0 %vm1607_vm4, %v1606_v14  ;;  %1152 = vmatprep.mubr.msk.bf16.mxu1 %vm1607_vm4, %v1606_v14  ;;  %p646_p6 = scmp.ge.s32.totalorder %s649_s29, 4  }
 0x2f8   : > { %v1608_v48 = vmov (%p646_p6), 0.0   ;;  %v1306_v49 = vld [vmem:[#allocation13] sm:$0xff] (%p646_p6)   ;;  %vm1609_vm5 = vmmov (%p646_p6), 0   ;;  %v1307_v50 = vld [vmem:[#allocation13 + $0x8] sm:$0xff] (%p646_p6)   ;;  %v1111_v54 = vld [vmem:[#allocation15] ss:$0 sm:$0xff] (%p646_p6) }
 0x2f9   : > { %s1113_s13 = sshll.u32 (%p646_p6), %s1672_s30, 6  ;;  %s925_s9 = sshll.u32 (%p646_p6), %s1961_s8, 4  ;;  %vm909_vm6 = vcmask (%p646_p6), 257024   ;;  %s1999_s9 = int_to_ptr.vmem [resolvable:$true] %s925_s9 }
 0x2fa   : > { %s1997_s17 = scalar_lea.hbm (%p646_p6), %s2049_s7, %s1113_s13  ;;  %s912_s18 = scalar_lea.sflag (%p646_p6), [#allocation6], %s1904_s21 }
 0x2fb   : >> { %v654_v15 = vld [vmem:[%s1971_s20] sm:$0xff]  ;;  %s1506_s23 = scalar_lea.vmem (%p646_p6), %s1999_s9, 64  ;;  %p2069_p4 = scmp.ne.s32.totalorder (%p646_p6), %s2059_s14, 0 }
 0x2fc   : >> { %v1103_v16 = vld [vmem:[%s1971_s20 + $0x20] sm:$0xff]  ;;  %655 = vxpose.xlu0.b32.start.end [1/1] (short) (narrow) %v654_v15, 8  ;;  %p1507_p9 = scmp.ne.s32.totalorder (%p646_p6), %s1999_s9, %s1506_s23  ;;  %s1610_s30 = smov (%p646_p6), [#allocation16]  }
 0x2fd   : >> { %v690_v17 = vpack.c.bf16 %v1103_v16, %v1103_v16  ;;  %v1105_v38 = vld [vmem:[%s1971_s20 + $0x40] sm:$0xff]  ;;  %s1510_s12 = sshll.u32 (%p646_p6), %s1610_s30, 4  ;;  %s1511_s12 = int_to_ptr.vmem [resolvable:$false] %s1510_s12 }
 0x2fe   : >> { %v693_v41 = vpack.c.bf16 %v1105_v38, %v1105_v38  ;;  %p1508_p13 = pnand (%p646_p6), %p1507_p9, %p2069_p4  ;;  %s1512_s29 = scalar_lea.vmem (%p646_p6), %s1511_s12, 128 }
 0x2ff   : >> { %v699_v18 = vsel %vm697_vm3, %v690_v17, 0  ;;  %p1513_p3 = scmp.lt.s32.totalorder (%p646_p6), %s1999_s9, %s1511_s12  ;;  %p1514_p2 = scmp.lt.s32.totalorder (%p646_p6), %s1512_s29, %s1506_s23 }
 0x300   : >> { %1145 = vmatpush3.bf16.msra.mxu0 %v699_v18  ;;  %p1509_p1 = pneg (%p646_p6), %p1508_p13 }
 0x301   : > { %1156 = vmatprep.subr.bf16.mxu0 (%p646_p6), %v1608_v48  ;;  %p1515_p0 = por (%p646_p6), %p1514_p2, %p1513_p3 }
 0x303   : > { %p1516_p10 = pnand (%p646_p6), %p1515_p0, %p1509_p1 }
 0x37c   : >> { %v671_v19 = vpop.trf.xlu0 }
 0x37d   : >> { %v687_v20 = vpack.c.bf16 %v671_v19, %v671_v19 }
 0x37f   : >> { %1147 = vmatmul.mubr.msk.bf16.vlgmr.msra.gmra.mrb[0].mxu0 %vm626_vm2, %v687_v20 }
 0x380   : > { %1160 = vmatprep.mubr.msk.bf16.mxu0 (%p646_p6), %vm1609_vm5, %v1608_v48  ;;  %1157 = vmatpush3.bf16.msra.mxu0 (%p646_p6), %v1306_v49 }
 0x381   : > { %1158 = vmatprep.subr.bf16.mxu0 (%p646_p6), %v1608_v48 }
 0x384   : > { %1159 = vmatpush3.bf16.msra.mxu0 (%p646_p6), %v1307_v50 }
 0x452   : >> { %v735_v21 = vpop.f32.mrb[0].mxu0 }
 0x453   : >> { %v741_v22 = vmul.f32 0.35355338, %v735_v21  ;;  %v1148_v23 = vpop.f32.mrb[1].mxu0 }
 0x454   : >> { %v738_v24 = vpop.f32.mrb[2].mxu0 }
 0x455   : >> { %v742_v25 = vsel %vm643_vm1, %v741_v22, -1e+30  ;;  %v1149_v26 = vpop.f32.mrb[3].mxu0 }
 0x456   : >> { %v743_v27 = vsel %vm626_vm2, %v742_v25, -inf }
 0x457   : >> { %744 = vmax.xlane.f32.xlu0 %v743_v27 }
 0x4e4   : >> { %v745_v28 = vpop.xlane.xlu0 %744 }
 0x4e5   : >> { %v746_v29 = vsub.f32 %v742_v25, %v745_v28 }
 0x4e7   : >> { %v747_v30 = vmul.f32 1.442695, %v746_v29 }
 0x4e9   : >> { %1302 = vpow2.f32 %v747_v30 }
 0x4f3   : >> { %v1303_v31 = vpop.eup %1302 }
 0x4f4   : >> { %v749_v32 = vsel %vm626_vm2, %v1303_v31, 0.0 }
 0x4f5   : >> { %750 = vadd.xlane.f32.xlu1 %v749_v32 }
 0x582   : >> { %v751_v33 = vpop.xlane.xlu1 %750 }
 0x583   : >> { %1304 = vrcp.f32 %v751_v33 }
 0x58d   : >> { %v1305_v34 = vpop.eup %1304 }
 0x58e   : >> { %v753_v35 = vmul.f32 %v1305_v34, %v1303_v31 }
 0x590   : >> { %v754_v36 = vpack.c.bf16 %v753_v35, %v753_v35 }
 0x592   : >> { %v759_v37 = vsel %vm626_vm2, %v754_v36, 0 }
 0x593   : >> { %1151 = vmatpush3.bf16.xpose.msra.mxu1 %v759_v37 }
 0x59a   : >> { %1153 = vmatmul.mubr.msk.bf16.vlgmr.msra.gmra.mrb[0].mxu1 %vm626_vm2, %v693_v41 }
 0x66a   : > { %648 = sbr.rel (!%p646_p6) target bundleno = 757 (0x2f5), region = 128 }
 0x66d   : >> { %v795_v42 = vpop.f32.mrb[0].mxu1 }
 0x66e   : >> { %802 = vst.msk [vmem:[%s801_s19] sm:$0xff] %vm626_vm2, %v795_v42  ;;  %v1154_v43 = vpop.f32.mrb[1].mxu1 }
 0x66f   : >> { %v798_v44 = vpop.f32.mrb[2].mxu1 }
 0x670   : >> { %v1155_v45 = vpop.f32.mrb[3].mxu1 }
 0x675   : > { %v803_v46 = vld [vmem:[#allocation3] sm:$0xff]  ;;  %v804_v47 = vld [vmem:[#allocation3 + $0x8] sm:$0xff]  ;;  %v805_v51 = vld [vmem:[#allocation3 + $0x10] sm:$0xff] }
 0x676   : > { %807 = vxpose.xlu0.b32.start [1/4] (short) (narrow) %v803_v46, 8  ;;  %v806_v52 = vld [vmem:[#allocation3 + $0x18] sm:$0xff] }
 0x67a   : > { %808 = vxpose.xlu0.b32.cont [2/4] (short) (narrow) %v804_v47, 8 }
 0x67e   : > { %809 = vxpose.xlu0.b32.cont [3/4] (short) (narrow) %v805_v51, 8 }
 0x682   : > { %810 = vxpose.xlu0.b32.end [4/4] (short) (narrow) %v806_v52, 8 }
 0x6f6   : > { %v823_v53 = vpop.trf.xlu0 }
 0x6f7   : > { %v839_v39 = vpack.c.bf16 %v823_v53, %v823_v53 }
 0x6f9   : > { %1161 = vmatmul.mubr.msk.bf16.vlgmr.msra.gmra.mrb[0].mxu0 %vm380_vm0, %v839_v39 }
 0x7cc   : > { %v893_v40 = vpop.f32.mrb[0].mxu0 }
 0x7cd   : > { %v899_v55 = vadd.f32 %v893_v40, %v1926_v1  ;;  %v1162_v56 = vpop.f32.mrb[1].mxu0 }
 0x7ce   : > { %v896_v57 = vpop.f32.mrb[2].mxu0 }
 0x7cf   : > { %v907_v58 = vadd.f32 %v1111_v54, %v899_v55  ;;  %v1163_v59 = vpop.f32.mrb[3].mxu0 }
 0x7d1   : > { %v908_v60 = vpack.c.bf16 %v907_v58, %v907_v58 }
 0x7d3   : > { %910 = vst.msk [vmem:[%s1961_s8] sm:$0xf] %vm909_vm6, %v908_v60 }
 0x7d4   : > { %1519 = shalt.err (!%p1516_p10)
}
 0x7d5   : > { %s1520_s21 = scalar_lea.hbm %s1997_s17, 64  ;;  %s1524_s20 = scalar_lea.hbm %s2049_s7, 128 }
 0x7d6   : > { %p1521_p11 = scmp.ne.s32.totalorder %s1997_s17, %s1520_s21  ;;  %p1525_p5 = scmp.lt.u32.totalorder %s1997_s17, %s2049_s7 }
 0x7d7   : > { %p1526_p7 = scmp.lt.u32.totalorder %s1524_s20, %s1520_s21  ;;  %p1528_p9 = scmp.lt.u32.totalorder %s1520_s21, %s1997_s17 }
 0x7d8   : > { %p1522_p12 = pnand %p1521_p11, %p2069_p4 }
 0x7d9   : > { %p1527_p6 = por %p1526_p7, %p1525_p5 }
 0x7da   : > { %p1523_p8 = pneg %p1522_p12 }
 0x7db   : > { %p1529_p13 = por %p1528_p9, %p1527_p6 }
 0x7dd   : > { %p1530_p1 = pnand %p1529_p13, %p1523_p8 }
 0x7df   : > { %1533 = shalt.err (!%p1530_p1)
}
 0x7e0   : > { %1194 = dma.vmem_to_hbm [thread:$0]  (%p2069_p4), %s1999_s9, 64, %s1997_s17, %s912_s18  }
 0x7e1 PF: > { %s937_s28 = sand.u32 1, %s1576_s24   ;;  %p2070_p3 = scmp.ne.s32.totalorder %s2060_s15, 0 }
 0x7e2   : > { %p2071_p2 = scmp.ge.s32.totalorder %s1588_s27, 2  ;;  %s938_s16 = scalar_lea.sflag [#allocation6], %s937_s28 }
 0x7e4   : > { %p1220_p0 = pnand %p2071_p2, %p2070_p3 }
 0x7e6   : > { %1571 = dma.done.wait (!%p1220_p0), %s938_s16, 64  }
 0x7e7   : > { %1573 = vsyncadd (!%p1220_p0), %s938_s16, 4294967232  ;;  %p23_p10 = scmp.ge.s32.totalorder %s1828_s11, 4   ;;  %s2072_s24 = smov %s1580_s25 }
 0x7e8   : > { %s2073_s25 = smov %s1584_s26  ;;  %s2074_s26 = smov %s1839_s22 }
 0x7e9   : > { %s2075_s27 = smov %s1828_s11  ;;  %25 = sbr.rel (!%p23_p10) target bundleno = 8 (0x8), region = 139 }
 0x7f0   :  { %943 = vsyncpa [#allocation5], 1 }
 0x7f1   :  { %945 = vsyncpa [#allocation5 + $0x1], 1 }
 0x7f2   :  { %946 = vsyncpa [#allocation8], 1 }
 0x7f3   :  { %947 = vsyncpa [#allocation11], 1 }
 0x7f4   :  { %948 = vsyncpa [#allocation14], 1 }
 0x7f5   :  { %949 = vsyncpa [#allocation6], 1 }
 0x7f6   :  { %951 = vsyncpa [#allocation6 + $0x1], 1 }

</bundles_post_ra>
